<compile_context>
chip_gen: v7x
topology: tpu7x:2x2x1
jax: 0.10.0
libtpu: 0.0.40
codegen_flags: <defaults>
</compile_context>

<pallas_src>
import jax
import jax.numpy as jnp
from jax.experimental import pallas as pl
from jax.experimental.pallas import tpu as pltpu


def qnetwork_kernel(xT_ref, w1_ref, b1_ref, w2_ref, b2_ref, w3_ref, b3_ref, o_ref):
    # fc1 + ReLU : [12,37] @ [37,TB] -> [12,TB]
    h1 = jnp.dot(w1_ref[...], xT_ref[...], preferred_element_type=jnp.float32)
    h1 = jnp.maximum(h1 + b1_ref[...], 0.0)
    # fc2 + ReLU : [12,12] @ [12,TB] -> [12,TB]
    h2 = jnp.dot(w2_ref[...], h1.astype(w2_ref.dtype),
                 preferred_element_type=jnp.float32)
    h2 = jnp.maximum(h2 + b2_ref[...], 0.0)
    # fc3 (no activation) : [4,12] @ [12,TB] -> [4,TB]
    out = jnp.dot(w3_ref[...], h2.astype(w3_ref.dtype),
                  preferred_element_type=jnp.float32) + b3_ref[...]
    o_ref[...] = out.astype(o_ref.dtype)


def _round_up(n, m):
    return ((n + m - 1) // m) * m


def qnetwork_forward(x, params, *, tile_b=None, use_bf16=False):
    """x: [B, 37] (PyTorch convention). params: torch layout (W [out,in], b [out,1])."""
    w1, b1, w2, b2, w3, b3 = params
    B, in_dim = x.shape
    out_dim = w3.shape[0]

    # Large lane-aligned batch tiles; VMEM use per step is tiny (<3 MiB at 8192).
    if tile_b is None:
        tile_b = min(2048, _round_up(B, 128))
    tile_b = max(128, _round_up(tile_b, 128))
    pB = _round_up(B, tile_b)

    # Pad batch, then transpose so batch sits on the 128-lane axis (lane-dense).
    xT = jnp.pad(x, ((0, pB - B), (0, 0))).T            # [37, pB]

    stream_dt = jnp.bfloat16 if use_bf16 else x.dtype
    xT = xT.astype(stream_dt)
    w1c, w2c, w3c = (w.astype(stream_dt) for w in (w1, w2, w3))
    # Biases stay f32: bias-add + ReLU are done in the f32 accumulator.

    def resident(a):
        # Whole-array block with a constant index_map -> fetched once, VMEM-resident.
        return pl.BlockSpec(a.shape, lambda i: (0, 0))

    outT = pl.pallas_call(
        qnetwork_kernel,
        out_shape=jax.ShapeDtypeStruct((out_dim, pB), jnp.float32),
        grid=(pB // tile_b,),
        in_specs=[
            pl.BlockSpec((in_dim, tile_b), lambda i: (0, i)),
            resident(w1c), resident(b1),
            resident(w2c), resident(b2),
            resident(w3c), resident(b3),
        ],
        out_specs=pl.BlockSpec((out_dim, tile_b), lambda i: (0, i)),
        compiler_params=pltpu.CompilerParams(
            dimension_semantics=("parallel",)),
    )(xT, w1c, b1, w2c, b2, w3c, b3)

    return outT.T[:B].astype(x.dtype)                   # back to [B, 4]


def init_params(key):
    """Deterministic init matching nn.Linear's U(-1/sqrt(fan_in), 1/sqrt(fan_in)).

    Weights are kept in the PyTorch [out_features, in_features] layout and
    biases as [out_features, 1] columns (kernel computes W @ x + b)."""
    dims = [(37, 12), (12, 12), (12, 4)]
    params = []
    for fan_in, fan_out in dims:
        key, kw, kb = jax.random.split(key, 3)
        bound = 1.0 / (fan_in ** 0.5)
        w = jax.random.uniform(kw, (fan_out, fan_in), jnp.float32, -bound, bound)
        b = jax.random.uniform(kb, (fan_out, 1), jnp.float32, -bound, bound)
        params.extend([w, b])
    return tuple(params)


def reference_forward(x, params):
    """Pure-JAX reference with PyTorch semantics: relu(xW1^T+b1) -> ... -> fc3."""
    w1, b1, w2, b2, w3, b3 = params
    h1 = jnp.maximum(x @ w1.T + b1.T, 0.0)
    h2 = jnp.maximum(h1 @ w2.T + b2.T, 0.0)
    return h2 @ w3.T + b3.T


if __name__ == "__main__":
    key = jax.random.PRNGKey(0)
    key, kx = jax.random.split(key)
    B = 300  # deliberately not a tile multiple -> exercises padding + multi-tile grid
    x = jax.random.normal(kx, (B, 37), jnp.float32)
    params = init_params(key)

    ref = reference_forward(x, params)

    # f32 path: 3 batch tiles of 128 rows (pipelined, lane-dense stores).
    out = jax.block_until_ready(qnetwork_forward(x, params, tile_b=128))
    assert out.shape == (B, 4), out.shape
    assert jnp.allclose(out, ref, atol=1e-4, rtol=1e-4), "f32 mismatch vs reference"

    # bf16-streaming path (halves HBM traffic on the bandwidth-bound input stream).
    out_bf16 = jax.block_until_ready(
        qnetwork_forward(x, params, tile_b=128, use_bf16=True))
    assert out_bf16.shape == (B, 4), out_bf16.shape
    assert jnp.allclose(out_bf16, ref, atol=5e-2, rtol=5e-2), "bf16 mismatch vs reference"

    print("KERNEL_OK")
</pallas_src>

<mosaic_0001>
module attributes {stable_mosaic.version = 11 : i64} {
  func.func @qnetwork_kernel(%arg0: i32, %arg1: memref<37x128xf32, #tpu.memory_space<vmem>>, %arg2: memref<12x37xf32, #tpu.memory_space<vmem>>, %arg3: memref<12x1xf32, #tpu.memory_space<vmem>>, %arg4: memref<12x12xf32, #tpu.memory_space<vmem>>, %arg5: memref<12x1xf32, #tpu.memory_space<vmem>>, %arg6: memref<4x12xf32, #tpu.memory_space<vmem>>, %arg7: memref<4x1xf32, #tpu.memory_space<vmem>>, %arg8: memref<4x128xf32, #tpu.memory_space<vmem>>) attributes {dimension_semantics = [#tpu.dimension_semantics<parallel>], iteration_bounds = array<i64: 3>, scalar_prefetch = 0 : i64, scratch_operands = 0 : i64, tpu.core_type = #tpu.core_type<tc>, window_params = [{transform_indices = @transform_0, window_bounds = array<i64: 37, 128>}, {pipeline_mode = #tpu.pipeline_mode<synchronous>, transform_indices = @transform_1, window_bounds = array<i64: 12, 37>}, {pipeline_mode = #tpu.pipeline_mode<synchronous>, transform_indices = @transform_2, window_bounds = array<i64: 12, 1>}, {pipeline_mode = #tpu.pipeline_mode<synchronous>, transform_indices = @transform_3, window_bounds = array<i64: 12, 12>}, {pipeline_mode = #tpu.pipeline_mode<synchronous>, transform_indices = @transform_4, window_bounds = array<i64: 12, 1>}, {pipeline_mode = #tpu.pipeline_mode<synchronous>, transform_indices = @transform_5, window_bounds = array<i64: 4, 12>}, {pipeline_mode = #tpu.pipeline_mode<synchronous>, transform_indices = @transform_6, window_bounds = array<i64: 4, 1>}, {transform_indices = @transform_7, window_bounds = array<i64: 4, 128>}]} {
    %c0 = arith.constant 0 : index
    %c0_0 = arith.constant 0 : index
    %0 = vector.load %arg2[%c0, %c0_0] : memref<12x37xf32, #tpu.memory_space<vmem>>, vector<12x37xf32>
    %c0_1 = arith.constant 0 : index
    %c0_2 = arith.constant 0 : index
    %1 = vector.load %arg1[%c0_1, %c0_2] : memref<37x128xf32, #tpu.memory_space<vmem>>, vector<37x128xf32>
    %cst = arith.constant dense<0.000000e+00> : vector<12x128xf32>
    %2 = tpu.matmul %0, %1, %cst {dimension_numbers = #tpu.dot_dimension_numbers<[1], [0], [0], [1], [0, 0, 1, 1], [], []>} : vector<12x37xf32>, vector<37x128xf32>, vector<12x128xf32> -> vector<12x128xf32>
    %c0_3 = arith.constant 0 : index
    %c0_4 = arith.constant 0 : index
    %3 = vector.load %arg3[%c0_3, %c0_4] : memref<12x1xf32, #tpu.memory_space<vmem>>, vector<12x1xf32>
    %4 = vector.broadcast %3 : vector<12x1xf32> to vector<12x128xf32>
    %5 = arith.addf %2, %4 : vector<12x128xf32>
    %cst_5 = arith.constant 0.000000e+00 : f32
    %6 = vector.broadcast %cst_5 : f32 to vector<12x128xf32>
    %7 = arith.maximumf %5, %6 : vector<12x128xf32>
    %c0_6 = arith.constant 0 : index
    %c0_7 = arith.constant 0 : index
    %8 = vector.load %arg4[%c0_6, %c0_7] : memref<12x12xf32, #tpu.memory_space<vmem>>, vector<12x12xf32>
    %cst_8 = arith.constant dense<0.000000e+00> : vector<12x128xf32>
    %9 = tpu.matmul %8, %7, %cst_8 {dimension_numbers = #tpu.dot_dimension_numbers<[1], [0], [0], [1], [0, 0, 1, 1], [], []>} : vector<12x12xf32>, vector<12x128xf32>, vector<12x128xf32> -> vector<12x128xf32>
    %c0_9 = arith.constant 0 : index
    %c0_10 = arith.constant 0 : index
    %10 = vector.load %arg5[%c0_9, %c0_10] : memref<12x1xf32, #tpu.memory_space<vmem>>, vector<12x1xf32>
    %11 = vector.broadcast %10 : vector<12x1xf32> to vector<12x128xf32>
    %12 = arith.addf %9, %11 : vector<12x128xf32>
    %cst_11 = arith.constant 0.000000e+00 : f32
    %13 = vector.broadcast %cst_11 : f32 to vector<12x128xf32>
    %14 = arith.maximumf %12, %13 : vector<12x128xf32>
    %c0_12 = arith.constant 0 : index
    %c0_13 = arith.constant 0 : index
    %15 = vector.load %arg6[%c0_12, %c0_13] : memref<4x12xf32, #tpu.memory_space<vmem>>, vector<4x12xf32>
    %cst_14 = arith.constant dense<0.000000e+00> : vector<4x128xf32>
    %16 = tpu.matmul %15, %14, %cst_14 {dimension_numbers = #tpu.dot_dimension_numbers<[1], [0], [0], [1], [0, 0, 1, 1], [], []>} : vector<4x12xf32>, vector<12x128xf32>, vector<4x128xf32> -> vector<4x128xf32>
    %c0_15 = arith.constant 0 : index
    %c0_16 = arith.constant 0 : index
    %17 = vector.load %arg7[%c0_15, %c0_16] : memref<4x1xf32, #tpu.memory_space<vmem>>, vector<4x1xf32>
    %18 = vector.broadcast %17 : vector<4x1xf32> to vector<4x128xf32>
    %19 = arith.addf %16, %18 : vector<4x128xf32>
    %c0_17 = arith.constant 0 : index
    %c0_18 = arith.constant 0 : index
    %20 = vector.load %arg8[%c0_17, %c0_18] : memref<4x128xf32, #tpu.memory_space<vmem>>, vector<4x128xf32>
    tpu.vector_store %arg8[%c0_17, %c0_18], %19 {strides = array<i32>} : memref<4x128xf32, #tpu.memory_space<vmem>>, vector<4x128xf32>,
    return
  }
  func.func @transform_0(%arg0: i32) -> (i32, i32) {
    %c0_i32 = arith.constant 0 : i32
    %c0_i32_0 = arith.constant 0 : i32
    return %c0_i32, %arg0 : i32, i32
  }
  func.func @transform_1(%arg0: i32) -> (i32, i32) {
    %c0_i32 = arith.constant 0 : i32
    %c0_i32_0 = arith.constant 0 : i32
    %c0_i32_1 = arith.constant 0 : i32
    return %c0_i32, %c0_i32_0 : i32, i32
  }
  func.func @transform_2(%arg0: i32) -> (i32, i32) {
    %c0_i32 = arith.constant 0 : i32
    %c0_i32_0 = arith.constant 0 : i32
    %c0_i32_1 = arith.constant 0 : i32
    return %c0_i32, %c0_i32_0 : i32, i32
  }
  func.func @transform_3(%arg0: i32) -> (i32, i32) {
    %c0_i32 = arith.constant 0 : i32
    %c0_i32_0 = arith.constant 0 : i32
    %c0_i32_1 = arith.constant 0 : i32
    return %c0_i32, %c0_i32_0 : i32, i32
  }
  func.func @transform_4(%arg0: i32) -> (i32, i32) {
    %c0_i32 = arith.constant 0 : i32
    %c0_i32_0 = arith.constant 0 : i32
    %c0_i32_1 = arith.constant 0 : i32
    return %c0_i32, %c0_i32_0 : i32, i32
  }
  func.func @transform_5(%arg0: i32) -> (i32, i32) {
    %c0_i32 = arith.constant 0 : i32
    %c0_i32_0 = arith.constant 0 : i32
    %c0_i32_1 = arith.constant 0 : i32
    return %c0_i32, %c0_i32_0 : i32, i32
  }
  func.func @transform_6(%arg0: i32) -> (i32, i32) {
    %c0_i32 = arith.constant 0 : i32
    %c0_i32_0 = arith.constant 0 : i32
    %c0_i32_1 = arith.constant 0 : i32
    return %c0_i32, %c0_i32_0 : i32, i32
  }
  func.func @transform_7(%arg0: i32) -> (i32, i32) {
    %c0_i32 = arith.constant 0 : i32
    %c0_i32_0 = arith.constant 0 : i32
    return %c0_i32, %arg0 : i32, i32
  }
}

</mosaic_0001>

<bundles_post_ra>
// kernel: tpu_custom_call.1
= control target key start
LH: loop header
LB: loop body
LE: loop exit
PB: predicated region body
PF: predicated region fallthrough
CT: control target
= control target key end

     0   :  { %12 = vsyncpa [#allocation3], 0  ;;  %s1156_s0 = inlined_call_operand.hbm [shape: f32[37,384], index: 0, kind: input, shape index: {}]   ;;  %s1157_s1 = inlined_call_operand.vmem [shape: f32[12,37], index: 1, kind: input, shape index: {}]   ;;  %s1158_s2 = inlined_call_operand.vmem [shape: f32[12,1], index: 2, kind: input, shape index: {}]   ;;  %s1159_s3 = inlined_call_operand.vmem [shape: f32[12,12], index: 3, kind: input, shape index: {}]   ;;  %s1160_s4 = inlined_call_operand.vmem [shape: f32[12,1], index: 4, kind: input, shape index: {}]   ;;  %s1161_s5 = inlined_call_operand.vmem [shape: f32[4,12], index: 5, kind: input, shape index: {}]   ;;  %s1162_s6 = inlined_call_operand.vmem [shape: f32[4,1], index: 6, kind: input, shape index: {}]   ;;  %s1163_s7 = inlined_call_operand.hbm [shape: f32[4,384], index: 7, kind: output, shape index: {}]  }
   0x1   :  { %14 = vsyncpa [#allocation3 + $0x1], 0 }
   0x2   :  { %15 = vsyncpa [#allocation4], 0 }
   0x3   :  { %17 = vsyncpa [#allocation4 + $0x1], 0  ;;  %s956_s24 = smov 0   ;;  %s958_s25 = smov 0  }
   0x4   :  { %s960_s26 = smov 0   ;;  %s962_s27 = smov 0  }
   0x5 LB: > { %s977_s28 = sadd.s32 4294967295, %s904_s27   ;;  %s673_s29 = sadd.s32 4294967294, %s904_s27   ;;  %s904_s27 = sphi %s962_s27, %s1177_s27   ;;  %s900_s26 = sphi %s960_s26, %s1176_s26   ;;  %s896_s25 = sphi %s958_s25, %s1175_s25   ;;  %s892_s24 = sphi %s956_s24, %s1174_s24  }
   0x6   : > { %s981_s30 = sadd.s32 1, %s904_s27   ;;  %s30_s8 = sadd.s32 1, %s900_s26 }
   0x7   : > { %s27_s9 = ssub.s32 %s904_s27, %s981_s30  ;;  %p37_p0 = scmp.ne.s32.totalorder %s900_s26, %s896_s25 }
   0x8   : > { %p28_p1 = scmp.eq.s32.totalorder %s27_s9, 0  ;;  %p38_p2 = scmp.eq.s32.totalorder %s904_s27, 0 }
   0x9   : > { %p43_p3 = scmp.ne.s32.totalorder %s896_s25, %s892_s24  ;;  %p44_p4 = scmp.eq.s32.totalorder %s977_s28, 0 }
   0xa   : > { %s993_s10 = scalar_select %p28_p1, %s900_s26, %s30_s8  }
   0xb   : > { %p39_p5 = por %p38_p2, %p37_p0  ;;  %p995_p6 = por %p44_p4, %p43_p3 }
   0xc   : > { %p193_p7 = scmp.eq.s32.totalorder %s977_s28, 2  ;;  %p199_p8 = scmp.eq.s32.totalorder %s673_s29, 2 }
   0xd   : > { %p764_p9 = scmp.lt.s32.totalorder %s904_s27, 3  ;;  %s237_s14 = sand.u32 1, %s900_s26  }
   0xe   : > { %p1001_p10 = por %p193_p7, %p37_p0  ;;  %p1005_p11 = por %p199_p8, %p43_p3 }
   0xf   : > { %s676_s15 = sshll.u32 %s904_s27, 7  ;;  %s750_s16 = smul.u32 40, %s237_s14 }
  0x10   : > { %s1166_s12 = scalar_select %p1001_p10, 1, 0 }
  0x11   : > { %s1167_s13 = scalar_select %p1005_p11, 1, 0 }
  0x12   : > { %s1014_s19 = scalar_lea.hbm %s1156_s0, %s676_s15  ;;  %p1016_p12 = pnand %p764_p9, %p39_p5 }
  0x13   : > { %s241_s21 = scalar_lea.vmem [#allocation2], %s750_s16  ;;  %s1023_s23 = scalar_lea.sflag [#allocation3], %s237_s14 }
  0x14   : > { %s247_s22 = sshll.u32 %s241_s21, 4  ;;  %s808_s29 = scalar_lea.hbm %s1014_s19, 640  ;;  %s1020_s22 = int_to_ptr.vmem [resolvable:$true] %s247_s22 }
  0x15   : > { %p809_p0 = scmp.ne.s32.totalorder %s1014_s19, %s808_s29  ;;  %p810_p1 = pneg %p1016_p12 }
  0x16   : > { %s813_s15 = scalar_lea.hbm %s1156_s0, 1920  ;;  %p814_p4 = scmp.lt.u32.totalorder %s1014_s19, %s1156_s0 }
  0x17   : > { %p811_p2 = pnand %p810_p1, %p809_p0  ;;  %p815_p5 = scmp.lt.u32.totalorder %s813_s15, %s808_s29 }
  0x18   : > { %p817_p8 = scmp.lt.u32.totalorder %s808_s29, %s1014_s19 }
  0x19   : > { %p812_p3 = pneg %p811_p2  ;;  %p816_p7 = por %p815_p5, %p814_p4 }
  0x1b   : > { %p818_p9 = por %p817_p8, %p816_p7 }
  0x1d   : > { %p819_p13 = pnand %p818_p9, %p812_p3 }
  0x1f   : > { %822 = shalt.err (!%p819_p13)
}
  0x20   : > { %s823_s14 = scalar_lea.vmem %s1020_s22, 640  ;;  %s906_s18 = smov [#allocation2]  }
  0x21   : > { %p824_p0 = scmp.ne.s32.totalorder %s1020_s22, %s823_s14  ;;  %s828_s21 = sshll.u32 %s906_s18, 4  ;;  %s829_s21 = int_to_ptr.vmem [resolvable:$false] %s828_s21 }
  0x22   : > { %s830_s8 = scalar_lea.vmem %s829_s21, 1280  ;;  %p831_p10 = scmp.lt.s32.totalorder %s1020_s22, %s829_s21 }
  0x23   : > { %p826_p2 = pnand %p824_p0, %p810_p1  ;;  %p832_p4 = scmp.lt.s32.totalorder %s830_s8, %s823_s14 }
  0x25   : > { %p827_p11 = pneg %p826_p2  ;;  %p833_p5 = por %p832_p4, %p831_p10 }
  0x27   : > { %p834_p7 = pnand %p833_p5, %p827_p11 }
  0x29   : > { %837 = shalt.err (!%p834_p7)
}
  0x2a   : > { %s907_s29 = smov 384   ;;  %s908_s9 = smov 128  }
  0x2b   : > { %s909_s15 = smov 8   ;;  %p255_p13 = scmp.lt.s32.totalorder %s904_s27, 4 }
  0x2c   : > { %759 = dma.hbm_to_vmem [thread:$0]  (!%p1016_p12), %s1014_s19, 640, %s1020_s22, %s1023_s23, %s907_s29, %s908_s9, %s909_s15  }
  0x2d   : > { %p1169_p1 = scmp.ge.s32.totalorder %s904_s27, 1 }
  0x2f   : > { %p256_p3 = pnand %p1169_p1, %p255_p13 }
  0x30   : > { %s1055_s17 = sand.u32 (!%p256_p3), 1, %s896_s25  }
  0x31   : > { %259 = sbr.rel (%p256_p3) target bundleno = 743 (0x2e7), region = 48  ;;  %s262_s14 = scalar_lea.sflag (!%p256_p3), [#allocation3], %s1055_s17 }
  0x32   : > { %s751_s16 = smul.u32 (!%p256_p3), 40, %s1055_s17 }
  0x34   : > { %s265_s18 = scalar_lea.vmem (!%p256_p3), [#allocation2], %s751_s16 }
  0x38   : > { %883 = dma.done.wait (%p995_p6), %s262_s14, 640  }
  0x39   : > { %885 = vsyncadd (%p995_p6), %s262_s14, 4294966656  ;;  %v910_v0 = vmov 0   ;;  %vm315_vm0 = vcmask 302080   ;;  %v298_v1 = vld [vmem:[%s265_s18] sm:$0xff]  ;;  %v299_v2 = vld [vmem:[%s265_s18 + $0x8] sm:$0xff]  ;;  %vm322_vm1 = vcmask 1044480  }
  0x3a   : > { %806 = vset.pattern.permute.xlu0 %v910_v0  ;;  %807 = vset.pattern.permute.xlu1 %v910_v0  ;;  %v300_v3 = vld [vmem:[%s265_s18 + $0x10] sm:$0xff]  ;;  %v732_v4 = vpack.c.bf16 %v299_v2, %v298_v1  ;;  %v301_v5 = vld [vmem:[%s265_s18 + $0x18] sm:$0xff]  ;;  %v304_v9 = vld [vmem:[%s1158_s2 + $0x8] sm:$0xf]  ;;  %vm417_vm2 = vcmask 97280   ;;  %vm424_vm3 = vcmask 1043456  }
  0x3b   : > { %v296_v6 = vld [vmem:[%s1157_s1] sm:$0xff]  ;;  %v736_v7 = vpack.c.bf16 %v301_v5, %v300_v3  ;;  %v297_v12 = vld [vmem:[%s1157_s1 + $0x8] sm:$0xf]  ;;  %vm911_vm4 = vmmov 1   ;;  %v912_v27 = vmov 0.0|0.0   ;;  %vm913_vm6 = vmmov 0  }
  0x3c   : > { %715 = vmatprep.mubr.msk.f32.mxu0 %vm315_vm0, %v296_v6  ;;  %v303_v8 = vld [vmem:[%s1158_s2] sm:$0xff]  ;;  %733 = vmatprep.subr.bf16.mxu0 %v732_v4  ;;  %v406_v15 = vld [vmem:[%s1160_s4 + $0x8] sm:$0xf]  ;;  %vm1090_vm5 = vmpackc.low %vm424_vm3, %vm911_vm4  ;;  %v914_v28 = vmov 0.0   ;;  %s678_s29 = sshll.u32 %s1055_s17, 2  ;;  %s688_s9 = sshll.u32 %s977_s28, 6 }
  0x3d   : > { %307 = vperm.xlu0 %806, %v303_v8   ;;  %735 = vmatpush3.bf16.msra.mxu0 %v732_v4  ;;  %v302_v10 = vld [vmem:[%s265_s18 + $0x20] sm:$0x1f]  ;;  %s295_s15 = scalar_lea.vmem [#allocation5], %s678_s29  ;;  %s1113_s19 = scalar_lea.hbm %s1163_s7, %s688_s9 }
  0x3e   : > { %737 = vmatprep.subr.bf16.mxu0 %v736_v7  ;;  %v506_v11 = vld [vmem:[%s1162_s6] sm:$0xf]  ;;  %v404_v26 = vld [vmem:[%s1159_s3 + $0x8] sm:$0xf]  ;;  %s603_s16 = sshll.u32 %s295_s15, 4  ;;  %s590_s20 = scalar_lea.sflag [#allocation4], %s1055_s17  ;;  %s1115_s16 = int_to_ptr.vmem [resolvable:$true] %s603_s16 }
  0x3f   : > { %v403_v13 = vld [vmem:[%s1159_s3] sm:$0xff]  ;;  %s838_s22 = scalar_lea.vmem %s1115_s16, 64  ;;  %p1172_p10 = scmp.ne.s32.totalorder %s1166_s12, 0 }
  0x40   : > { %722 = vmatprep.mubr.msk.f32.mxu1 %vm417_vm2, %v403_v13  ;;  %v405_v14 = vld [vmem:[%s1160_s4] sm:$0xff]  ;;  %p839_p6 = scmp.ne.s32.totalorder %s1115_s16, %s838_s22  ;;  %s915_s28 = smov [#allocation5]  }
  0x41   : > { %312 = vperm.xlu0 %806, %v304_v9   ;;  %739 = vmatpush3.bf16.msra.mxu0 %v736_v7  ;;  %v505_v38 = vld [vmem:[%s1161_s5] sm:$0xf]  ;;  %s842_s23 = sshll.u32 %s915_s28, 4  ;;  %s843_s23 = int_to_ptr.vmem [resolvable:$false] %s842_s23 }
  0x42   : > { %713 = vmatprep.subr.msk.mxu0 %vm322_vm1, %v302_v10  ;;  %409 = vperm.xlu1 %807, %v405_v14   ;;  %p840_p11 = pnand %p839_p6, %p1172_p10  ;;  %s844_s11 = scalar_lea.vmem %s843_s23, 128 }
  0x43   : > { %p845_p8 = scmp.lt.s32.totalorder %s1115_s16, %s843_s23  ;;  %p846_p9 = scmp.lt.s32.totalorder %s844_s11, %s838_s22 }
  0x44   : > { %p841_p12 = pneg %p840_p11 }
  0x45   : > { %509 = vperm.xlu0 %806, %v506_v11   ;;  %714 = vmatpush3.msk.msra.mxu0 %vm322_vm1, %v302_v10  ;;  %p847_p0 = por %p846_p9, %p845_p8 }
  0x46   : > { %716 = vmatmul.mubr.msk.f32.vlgmr.msra.gmra.mrb[0].mxu0 %vm315_vm0, %v297_v12  ;;  %414 = vperm.xlu1 %807, %v406_v15  }
  0x47   : > { %p848_p2 = pnand %p847_p0, %p841_p12 }
  0xbc   : > { %v308_v16 = vpop.permute.xlu0 %307 }
  0xc0   : > { %v313_v17 = vpop.permute.xlu0 %312 }
  0xc1   : > { %v410_v29 = vpop.permute.xlu1 %409 }
  0xc4   : > { %v510_v39 = vpop.permute.xlu0 %509 }
  0xc5   : > { %v415_v30 = vpop.permute.xlu1 %414 }
 0x119   : > { %v717_v18 = vpop.f32.mrb[0].mxu0 }
 0x11a   : > { %v398_v19 = vadd.f32 %v717_v18, %v313_v17  ;;  %v392_v20 = vpop.f32.mrb[1].mxu0 }
 0x11b   : > { %v393_v21 = vadd.f32 %v392_v20, %v308_v16 }
 0x11c   : > { %v402_v22 = vmax.f32 %v398_v19, 0.0 }
 0x11d   : > { %v401_v23 = vmax.f32 %v393_v21, 0.0 }
 0x11f   : > { %v740_v25 = vpack.c.bf16 %v402_v22, %v401_v23 }
 0x121   : > { %742 = vmatprep.subr.msk.bf16.mxu1 %vm1090_vm5, %v740_v25 }
 0x122   : > { %745 = vmatpush3.bf16.msk.msra.mxu1 %vm1090_vm5, %v740_v25 }
 0x123   : > { %746 = vmatprep.subr.bf16.mxu1 %v912_v27 }
 0x125   : > { %723 = vmatmul.mubr.msk.f32.vlgmr.msra.gmra.mrb[0].mxu1 %vm417_vm2, %v404_v26 }
 0x126   : > { %729 = vmatprep.mubr.msk.f32.mxu1 %vm913_vm6, %v914_v28 }
 0x1f8   : > { %v724_v31 = vpop.f32.mrb[0].mxu1 }
 0x1f9   : > { %v500_v32 = vadd.f32 %v724_v31, %v415_v30  ;;  %v494_v33 = vpop.f32.mrb[1].mxu1 }
 0x1fa   : > { %v495_v34 = vadd.f32 %v494_v33, %v410_v29 }
 0x1fb   : > { %v504_v35 = vmax.f32 %v500_v32, 0.0 }
 0x1fc   : > { %v503_v36 = vmax.f32 %v495_v34, 0.0 }
 0x1fe   : > { %v747_v37 = vpack.c.bf16 %v504_v35, %v503_v36 }
 0x200   : > { %749 = vmatpush3.bf16.msk.msra.mxu1 %vm1090_vm5, %v747_v37 }
 0x203   : > { %730 = vmatmul.mubr.msk.f32.vlgmr.msra.gmra.mrb[2].mxu1 %vm417_vm2, %v505_v38 }
 0x2d6   : > { %v584_v40 = vpop.f32.mrb[2].mxu1 }
 0x2d7   : > { %v585_v41 = vadd.f32 %v584_v40, %v510_v39  ;;  %v731_v42 = vpop.f32.mrb[3].mxu1 }
 0x2d9   : > { %588 = vst [vmem:[%s295_s15] sm:$0xf] %v585_v41 }
 0x2da   : > { %851 = shalt.err (!%p848_p2)
}
 0x2db   : > { %s852_s17 = scalar_lea.hbm %s1113_s19, 64  ;;  %s856_s29 = scalar_lea.hbm %s1163_s7, 192 }
 0x2dc   : > { %p853_p4 = scmp.ne.s32.totalorder %s1113_s19, %s852_s17  ;;  %p857_p13 = scmp.lt.u32.totalorder %s1113_s19, %s1163_s7 }
 0x2dd   : > { %p858_p1 = scmp.lt.u32.totalorder %s856_s29, %s852_s17  ;;  %p860_p6 = scmp.lt.u32.totalorder %s852_s17, %s1113_s19 }
 0x2de   : > { %p854_p5 = pnand %p853_p4, %p1172_p10 }
 0x2df   : > { %p859_p3 = por %p858_p1, %p857_p13 }
 0x2e0   : > { %p855_p7 = pneg %p854_p5 }
 0x2e1   : > { %p861_p11 = por %p860_p6, %p859_p3 }
 0x2e3   : > { %p862_p12 = pnand %p861_p11, %p855_p7 }
 0x2e5   : > { %865 = shalt.err (!%p862_p12)
}
 0x2e6   : > { %754 = dma.vmem_to_hbm [thread:$0]  (%p1172_p10), %s1115_s16, 64, %s1113_s19, %s590_s20  }
 0x2e7 PF: > { %p765_p8 = scmp.ge.s32.totalorder %s904_s27, 2  ;;  %s615_s14 = sand.u32 1, %s892_s24  }
 0x2e8   : > { %p1173_p9 = scmp.ne.s32.totalorder %s1167_s13, 0  ;;  %s616_s18 = scalar_lea.sflag [#allocation4], %s615_s14 }
 0x2ea   : > { %p761_p0 = pnand %p765_p8, %p1173_p9 }
 0x2ec   : > { %887 = dma.done.wait (!%p761_p0), %s616_s18, 64  }
 0x2ed   : > { %889 = vsyncadd (!%p761_p0), %s616_s18, 4294967232  ;;  %p20_p2 = scmp.ge.s32.totalorder %s981_s30, 5   ;;  %s1174_s24 = smov %s896_s25 }
 0x2ee   : > { %s1175_s25 = smov %s900_s26  ;;  %s1176_s26 = smov %s993_s10 }
 0x2ef   : > { %s1177_s27 = smov %s981_s30  ;;  %22 = sbr.rel (!%p20_p2) target bundleno = 5 (0x5), region = 93 }
 0x2f6   :  { %621 = vsyncpa [#allocation3], 1 }
 0x2f7   :  { %623 = vsyncpa [#allocation3 + $0x1], 1 }
 0x2f8   :  { %624 = vsyncpa [#allocation4], 1 }
 0x2f9   :  { %626 = vsyncpa [#allocation4 + $0x1], 1 }

</bundles_post_ra>
